<compile_context>
chip_gen: v7x
topology: tpu7x:2x2x1
jax: 0.10.0
libtpu: 0.0.40
codegen_flags: <defaults>
</compile_context>

<pallas_src>
import jax
import jax.numpy as jnp
from jax.experimental import pallas as pl
from jax.experimental.pallas import tpu as pltpu


def _row_tile(itemsize: int, n: int) -> int:
    """Rows gathered per grid step: sublane-aligned for the dtype, large enough
    to amortize the ~0.35 us/step grid overhead, capped so small sequences
    still produce >= 2 grid steps (useful for v7x's 2 TensorCores)."""
    sub = {4: 8, 2: 16, 1: 32}.get(itemsize, 8)
    target = 8 * sub                       # 64 rows f32 / 128 bf16 / 256 int8|fp8
    half = -(-n // 2)                      # cdiv(n, 2): allow two grid steps
    cap = max(sub, ((half + sub - 1) // sub) * sub)
    return min(target, cap)


def _vmem_gather_kernel(idx_ref, w_ref, out_ref):
    # idx_ref: scalar-prefetched indices in SMEM, shape (N,)
    # w_ref:   full (V, D) embedding table resident in VMEM (grid-invariant)
    # out_ref: (TB, D) output tile for this grid step
    i = pl.program_id(0)
    n_idx = idx_ref.shape[0]               # static
    tb = out_ref.shape[0]                  # static
    rows = []
    for j in range(tb):
        flat = jnp.minimum(i * tb + j, n_idx - 1)    # clamp padded tail rows
        row = idx_ref[flat]
        rows.append(w_ref[pl.ds(row, 1), :])         # (1, D) dynamic row load
    # One dense (TB, D) store instead of TB masked single-row stores.
    out_ref[...] = jnp.concatenate(rows, axis=0)


def _hbm_gather_kernel(idx_ref, w_hbm, out_ref, sem):
    # idx_ref: scalar-prefetched indices in SMEM, shape (N,)
    # w_hbm:   (V, D) table left in HBM (raw ref, manual per-row DMA)
    # out_ref: (TB, D) output tile -- rows are DMA'd straight into it
    # sem:     DMA semaphores, shape (TB,)
    i = pl.program_id(0)
    n_idx = idx_ref.shape[0]
    tb = out_ref.shape[0]
    copies = []
    for j in range(tb):
        flat = jnp.minimum(i * tb + j, n_idx - 1)    # clamp padded tail rows
        row = idx_ref[flat]
        cp = pltpu.make_async_copy(w_hbm.at[row], out_ref.at[j], sem.at[j])
        cp.start()
        copies.append(cp)
    for cp in copies:                       # wait on the SAME descriptors
        cp.wait()


def embedding_lookup(weight: jax.Array, x: jax.Array,
                     *, force_hbm_gather: bool = False) -> jax.Array:
    """Return weight[x] (stacked rows) — PyTorch Embedding.forward."""
    V, D = weight.shape
    N = int(x.shape[0])
    itemsize = weight.dtype.itemsize
    tb = _row_tile(itemsize, N)
    n_blocks = pl.cdiv(N, tb)

    # PyTorch Embedding raises on OOB indices; clamp to keep accesses in bounds.
    idx = jnp.clip(x.astype(jnp.int32), 0, V - 1)

    try:
        vmem_cap = pltpu.get_tpu_info().vmem_capacity_bytes
    except Exception:  # pragma: no cover - conservative fallback (v7x per-TC)
        vmem_cap = 64 << 20

    table_bytes = V * D * itemsize
    tile_bytes = tb * D * itemsize
    use_vmem_table = (not force_hbm_gather) and (table_bytes <= vmem_cap // 4)

    # Memory-bound gather: tell XLA roughly how many bytes move.
    cost = pl.CostEstimate(
        flops=0, transcendentals=0,
        bytes_accessed=2 * N * D * itemsize + (table_bytes if use_vmem_table else 0))

    cp_kwargs = {"dimension_semantics": ("parallel",)}   # disjoint output tiles
    needed = (2 * table_bytes if use_vmem_table else 0) + 4 * tile_bytes + (2 << 20)
    if needed > (16 << 20):   # above the most conservative scoped default (v5e)
        cp_kwargs["vmem_limit_bytes"] = min(needed, int(vmem_cap * 0.9))

    if use_vmem_table:
        grid_spec = pltpu.PrefetchScalarGridSpec(
            num_scalar_prefetch=1,                       # idx lands in SMEM
            grid=(n_blocks,),
            in_specs=[pl.BlockSpec((V, D), lambda i, idx_ref: (0, 0))],
            out_specs=pl.BlockSpec((tb, D), lambda i, idx_ref: (i, 0)),
        )
        kernel = _vmem_gather_kernel
    else:
        grid_spec = pltpu.PrefetchScalarGridSpec(
            num_scalar_prefetch=1,
            grid=(n_blocks,),
            in_specs=[pl.BlockSpec(memory_space=pl.ANY)],  # table stays in HBM
            out_specs=pl.BlockSpec((tb, D), lambda i, idx_ref: (i, 0)),
            scratch_shapes=[pltpu.SemaphoreType.DMA((tb,))],
        )
        kernel = _hbm_gather_kernel

    # Exact (N, D) output: final partial block is masked on writeback, so no
    # trailing out[:N] slice (which re-streamed the whole result through HBM).
    return pl.pallas_call(
        kernel,
        grid_spec=grid_spec,
        out_shape=jax.ShapeDtypeStruct((N, D), weight.dtype),
        compiler_params=pltpu.CompilerParams(**cp_kwargs),
        cost_estimate=cost,
    )(idx, weight)


if __name__ == "__main__":
    # Module shapes: Embedding(num_embeddings=32, embedding_dim=128), seq len 16.
    num_embeddings, embedding_dim = 32, 128
    seq = 16

    key = jax.random.PRNGKey(0)
    k_w, k_x = jax.random.split(key)
    # Deterministic synthetic parameter (stands in for torch.randn weight).
    weight = jax.random.normal(k_w, (num_embeddings, embedding_dim), jnp.float32)
    x = jax.random.randint(k_x, (seq,), 0, num_embeddings, dtype=jnp.int32)
    ref = weight[x]

    # VMEM fast path (table is only 16 KiB -> resident gather).
    out = jax.block_until_ready(embedding_lookup(weight, x))
    assert out.shape == (seq, embedding_dim) and out.dtype == jnp.float32
    assert jnp.allclose(out, ref), "VMEM-path embedding gather mismatch"

    # HBM per-row DMA path (what large vocab tables would take).
    out_hbm = jax.block_until_ready(embedding_lookup(weight, x, force_hbm_gather=True))
    assert jnp.allclose(out_hbm, ref), "HBM-path embedding gather mismatch"

    # Ragged length (not a multiple of the row tile) exercises the masked tail.
    x_odd = x[:5]
    ref_odd = weight[x_odd]
    out_odd = jax.block_until_ready(embedding_lookup(weight, x_odd))
    assert out_odd.shape == (5, embedding_dim)
    assert jnp.allclose(out_odd, ref_odd), "ragged VMEM-path gather mismatch"
    out_odd_hbm = jax.block_until_ready(
        embedding_lookup(weight, x_odd, force_hbm_gather=True))
    assert jnp.allclose(out_odd_hbm, ref_odd), "ragged HBM-path gather mismatch"

    print("KERNEL_OK")
</pallas_src>

<mosaic_0001>
module attributes {stable_mosaic.version = 11 : i64} {
  func.func @_vmem_gather_kernel(%arg0: i32, %arg1: memref<16xi32, #tpu.memory_space<smem>>, %arg2: memref<32x128xf32, #tpu.memory_space<vmem>>, %arg3: memref<8x128xf32, #tpu.memory_space<vmem>>) attributes {dimension_semantics = [#tpu.dimension_semantics<parallel>], iteration_bounds = array<i64: 2>, scalar_prefetch = 1 : i64, scratch_operands = 0 : i64, tpu.core_type = #tpu.core_type<tc>, window_params = [{pipeline_mode = #tpu.pipeline_mode<synchronous>, transform_indices = @transform_0, window_bounds = array<i64: 32, 128>}, {transform_indices = @transform_1, window_bounds = array<i64: 8, 128>}]} {
    %c8_i32 = arith.constant 8 : i32
    %0 = arith.muli %arg0, %c8_i32 : i32
    %c0_i32 = arith.constant 0 : i32
    %1 = arith.addi %0, %c0_i32 : i32
    %c15_i32 = arith.constant 15 : i32
    %2 = arith.minsi %1, %c15_i32 : i32
    %3 = arith.index_cast %2 : i32 to index
    %4 = memref.load %arg1[%3] : memref<16xi32, #tpu.memory_space<smem>>
    %5 = arith.index_cast %4 : i32 to index
    %c0 = arith.constant 0 : index
    %6 = vector.load %arg2[%5, %c0] : memref<32x128xf32, #tpu.memory_space<vmem>>, vector<1x128xf32>
    %c8_i32_0 = arith.constant 8 : i32
    %7 = arith.muli %arg0, %c8_i32_0 : i32
    %c1_i32 = arith.constant 1 : i32
    %8 = arith.addi %7, %c1_i32 : i32
    %c15_i32_1 = arith.constant 15 : i32
    %9 = arith.minsi %8, %c15_i32_1 : i32
    %10 = arith.index_cast %9 : i32 to index
    %11 = memref.load %arg1[%10] : memref<16xi32, #tpu.memory_space<smem>>
    %12 = arith.index_cast %11 : i32 to index
    %c0_2 = arith.constant 0 : index
    %13 = vector.load %arg2[%12, %c0_2] : memref<32x128xf32, #tpu.memory_space<vmem>>, vector<1x128xf32>
    %c8_i32_3 = arith.constant 8 : i32
    %14 = arith.muli %arg0, %c8_i32_3 : i32
    %c2_i32 = arith.constant 2 : i32
    %15 = arith.addi %14, %c2_i32 : i32
    %c15_i32_4 = arith.constant 15 : i32
    %16 = arith.minsi %15, %c15_i32_4 : i32
    %17 = arith.index_cast %16 : i32 to index
    %18 = memref.load %arg1[%17] : memref<16xi32, #tpu.memory_space<smem>>
    %19 = arith.index_cast %18 : i32 to index
    %c0_5 = arith.constant 0 : index
    %20 = vector.load %arg2[%19, %c0_5] : memref<32x128xf32, #tpu.memory_space<vmem>>, vector<1x128xf32>
    %c8_i32_6 = arith.constant 8 : i32
    %21 = arith.muli %arg0, %c8_i32_6 : i32
    %c3_i32 = arith.constant 3 : i32
    %22 = arith.addi %21, %c3_i32 : i32
    %c15_i32_7 = arith.constant 15 : i32
    %23 = arith.minsi %22, %c15_i32_7 : i32
    %24 = arith.index_cast %23 : i32 to index
    %25 = memref.load %arg1[%24] : memref<16xi32, #tpu.memory_space<smem>>
    %26 = arith.index_cast %25 : i32 to index
    %c0_8 = arith.constant 0 : index
    %27 = vector.load %arg2[%26, %c0_8] : memref<32x128xf32, #tpu.memory_space<vmem>>, vector<1x128xf32>
    %c8_i32_9 = arith.constant 8 : i32
    %28 = arith.muli %arg0, %c8_i32_9 : i32
    %c4_i32 = arith.constant 4 : i32
    %29 = arith.addi %28, %c4_i32 : i32
    %c15_i32_10 = arith.constant 15 : i32
    %30 = arith.minsi %29, %c15_i32_10 : i32
    %31 = arith.index_cast %30 : i32 to index
    %32 = memref.load %arg1[%31] : memref<16xi32, #tpu.memory_space<smem>>
    %33 = arith.index_cast %32 : i32 to index
    %c0_11 = arith.constant 0 : index
    %34 = vector.load %arg2[%33, %c0_11] : memref<32x128xf32, #tpu.memory_space<vmem>>, vector<1x128xf32>
    %c8_i32_12 = arith.constant 8 : i32
    %35 = arith.muli %arg0, %c8_i32_12 : i32
    %c5_i32 = arith.constant 5 : i32
    %36 = arith.addi %35, %c5_i32 : i32
    %c15_i32_13 = arith.constant 15 : i32
    %37 = arith.minsi %36, %c15_i32_13 : i32
    %38 = arith.index_cast %37 : i32 to index
    %39 = memref.load %arg1[%38] : memref<16xi32, #tpu.memory_space<smem>>
    %40 = arith.index_cast %39 : i32 to index
    %c0_14 = arith.constant 0 : index
    %41 = vector.load %arg2[%40, %c0_14] : memref<32x128xf32, #tpu.memory_space<vmem>>, vector<1x128xf32>
    %c8_i32_15 = arith.constant 8 : i32
    %42 = arith.muli %arg0, %c8_i32_15 : i32
    %c6_i32 = arith.constant 6 : i32
    %43 = arith.addi %42, %c6_i32 : i32
    %c15_i32_16 = arith.constant 15 : i32
    %44 = arith.minsi %43, %c15_i32_16 : i32
    %45 = arith.index_cast %44 : i32 to index
    %46 = memref.load %arg1[%45] : memref<16xi32, #tpu.memory_space<smem>>
    %47 = arith.index_cast %46 : i32 to index
    %c0_17 = arith.constant 0 : index
    %48 = vector.load %arg2[%47, %c0_17] : memref<32x128xf32, #tpu.memory_space<vmem>>, vector<1x128xf32>
    %c8_i32_18 = arith.constant 8 : i32
    %49 = arith.muli %arg0, %c8_i32_18 : i32
    %c7_i32 = arith.constant 7 : i32
    %50 = arith.addi %49, %c7_i32 : i32
    %c15_i32_19 = arith.constant 15 : i32
    %51 = arith.minsi %50, %c15_i32_19 : i32
    %52 = arith.index_cast %51 : i32 to index
    %53 = memref.load %arg1[%52] : memref<16xi32, #tpu.memory_space<smem>>
    %54 = arith.index_cast %53 : i32 to index
    %c0_20 = arith.constant 0 : index
    %55 = vector.load %arg2[%54, %c0_20] : memref<32x128xf32, #tpu.memory_space<vmem>>, vector<1x128xf32>
    %56 = tpu.concatenate %6, %13, %20, %27, %34, %41, %48, %55 in 0 : vector<1x128xf32>, vector<1x128xf32>, vector<1x128xf32>, vector<1x128xf32>, vector<1x128xf32>, vector<1x128xf32>, vector<1x128xf32>, vector<1x128xf32> -> vector<8x128xf32>
    %c0_21 = arith.constant 0 : index
    %c0_22 = arith.constant 0 : index
    %57 = vector.load %arg3[%c0_21, %c0_22] : memref<8x128xf32, #tpu.memory_space<vmem>>, vector<8x128xf32>
    tpu.vector_store %arg3[%c0_21, %c0_22], %56 {strides = array<i32>} : memref<8x128xf32, #tpu.memory_space<vmem>>, vector<8x128xf32>,
    return
  }
  func.func @transform_0(%arg0: i32, %arg1: memref<16xi32, #tpu.memory_space<smem>>) -> (i32, i32) {
    %c0_i32 = arith.constant 0 : i32
    %c0_i32_0 = arith.constant 0 : i32
    %c0_i32_1 = arith.constant 0 : i32
    return %c0_i32, %c0_i32_0 : i32, i32
  }
  func.func @transform_1(%arg0: i32, %arg1: memref<16xi32, #tpu.memory_space<smem>>) -> (i32, i32) {
    %c0_i32 = arith.constant 0 : i32
    %c0_i32_0 = arith.constant 0 : i32
    return %arg0, %c0_i32 : i32, i32
  }
}

</mosaic_0001>

<bundles_post_ra>
// kernel: tpu_custom_call.1
= control target key start
LH: loop header
LB: loop body
LE: loop exit
PB: predicated region body
PF: predicated region fallthrough
CT: control target
= control target key end

     0   :  { %s630_s0 = inlined_call_operand.hbm [shape: s32[16], index: 0, kind: input, shape index: {}]   ;;  %s631_s1 = inlined_call_operand.hbm [shape: f32[32,128], index: 1, kind: input, shape index: {}]   ;;  %s632_s2 = inlined_call_operand.hbm [shape: f32[16,128], index: 2, kind: output, shape index: {}]  }
   0x1   :  { %s344_s11 = scalar_lea.hbm %s630_s0, 16 }
   0x2   :  { %p345_p0 = scmp.ne.s32.totalorder %s630_s0, %s344_s11  ;;  %p348_p1 = scmp.lt.u32.totalorder %s344_s11, %s630_s0 }
   0x4   :  { %p350_p2 = pnand %p348_p1, %p345_p0 }
   0x6   :  { %353 = shalt.err (!%p350_p2)  }
   0x7   :  { %s452_s16 = smov [#allocation3]  }
   0x8   :  { %8 = dma.hbm_to_smem %s630_s0, 16, %s452_s16, [#allocation2] }
   0x9   :  { %426 = dma.done.wait [#allocation2], 16 }
   0xa   :  { %427 = vsyncadd [#allocation2], 4294967280 }
   0xb   :  { %10 = sfence }
   0xc   :  { %11 = vsyncpa [#allocation5], 0 }
   0xd   :  { %12 = vsyncpa [#allocation6], 0 }
   0xe   :  { %14 = vsyncpa [#allocation6 + $0x1], 0  ;;  %s484_s19 = smov 0   ;;  %s486_s20 = smov 0  }
   0xf   :  { %s488_s21 = smov 0   ;;  %s490_s22 = smov 0  }
  0x10 LB: > { %s505_s0 = sadd.s32 4294967295, %s450_s22   ;;  %s280_s23 = sadd.s32 4294967294, %s450_s22   ;;  %s450_s22 = sphi %s490_s22, %s648_s22   ;;  %s446_s21 = sphi %s488_s21, %s647_s21   ;;  %s442_s20 = sphi %s486_s20, %s646_s20   ;;  %s438_s19 = sphi %s484_s19, %s645_s19  }
  0x11   : > { %s509_s24 = sadd.s32 1, %s450_s22   ;;  %s48_s25 = sadd.s32 1, %s446_s21 }
  0x12   : > { %s45_s26 = ssub.s32 %s450_s22, %s509_s24  ;;  %p58_p3 = scmp.ne.s32.totalorder %s446_s21, %s442_s20 }
  0x13   : > { %p46_p4 = scmp.eq.s32.totalorder %s45_s26, 0  ;;  %p59_p5 = scmp.eq.s32.totalorder %s505_s0, 1 }
  0x14   : > { %p64_p6 = scmp.ne.s32.totalorder %s442_s20, %s438_s19  ;;  %p65_p7 = scmp.eq.s32.totalorder %s280_s23, 1 }
  0x15   : > { %s520_s27 = scalar_select %p46_p4, %s446_s21, %s48_s25  }
  0x16   : > { %p522_p8 = por %p59_p5, %p58_p3  ;;  %p526_p9 = por %p65_p7, %p64_p6 }
  0x17   : > { %p281_p10 = scmp.ge.s32.totalorder %s450_s22, 1  ;;  %p72_p11 = scmp.lt.s32.totalorder %s450_s22, 3 }
  0x18   : > { %s636_s28 = scalar_select %p522_p8, 1, 0 }
  0x19   : > { %s637_s29 = scalar_select %p526_p9, 1, 0 }
  0x1a   : > { %p633_p12 = scmp.eq.s32.totalorder %s505_s0, 0  ;;  %p533_p13 = pnand %p281_p10, %p72_p11 }
  0x1b   : > { %s453_s3 = smov [#allocation4]   ;;  %s354_s8 = scalar_lea.hbm %s631_s1, 512 }
  0x1c   : > { %s638_s30 = scalar_select %p533_p13, 1, 0 }
  0x1d   : > { %s84_s4 = sshll.u32 %s453_s3, 4  ;;  %p297_p0 = pneg %p533_p13  ;;  %s85_s4 = int_to_ptr.vmem [resolvable:$true] %s84_s4 }
  0x1e   : > { %p355_p2 = scmp.ne.s32.totalorder %s631_s1, %s354_s8  ;;  %p361_p6 = scmp.lt.u32.totalorder %s354_s8, %s631_s1 }
  0x1f   : > { %p541_p1 = pnand %p633_p12, %p297_p0 }
  0x21   : > { %p356_p3 = pneg %p541_p1 }
  0x23   : > { %p357_p4 = pnand %p356_p3, %p355_p2 }
  0x25   : > { %p358_p5 = pneg %p357_p4 }
  0x27   : > { %p363_p7 = pnand %p361_p6, %p358_p5 }
  0x29   : > { %366 = shalt.err (!%p363_p7)
}
  0x2a   : > { %s367_s13 = scalar_lea.vmem %s85_s4, 512  ;;  %p375_p12 = scmp.lt.s32.totalorder %s85_s4, %s85_s4 }
  0x2b   : > { %p368_p10 = scmp.ne.s32.totalorder %s85_s4, %s367_s13  ;;  %p376_p9 = scmp.lt.s32.totalorder %s367_s13, %s367_s13 }
  0x2d   : > { %p370_p11 = pnand %p368_p10, %p356_p3  ;;  %p377_p8 = por %p376_p9, %p375_p12 }
  0x2f   : > { %p371_p0 = pneg %p370_p11 }
  0x31   : > { %p378_p13 = pnand %p377_p8, %p371_p0 }
  0x33   : > { %381 = shalt.err (!%p378_p13)
}
  0x34   : > { %s454_s14 = smov 128   ;;  %s455_s15 = smov 8  }
  0x35   : > { %300 = dma.hbm_to_vmem [thread:$0]  (!%p541_p1), %s631_s1, 512, %s85_s4, [#allocation5], %s454_s14, %s454_s14, %s455_s15  }
  0x36   : > { %p640_p2 = scmp.ne.s32.totalorder %s638_s30, 0 }
  0x37   : > { %p641_p4 = scmp.eq.s32.totalorder (!%p640_p2), %s505_s0, 0 }
  0x38   : > { %100 = sbr.rel (%p640_p2) target bundleno = 111 (0x6f), region = 24 }
  0x3f   : > { %429 = dma.done.wait (%p641_p4), [#allocation5], 512   ;;  %p642_p3 = pmov %p641_p4 }
  0x40   : > { %s568_s18 = sshll.u32 %s505_s0, 3  ;;  %vm184_vm0 = vcmask 1040384   ;;  %vm186_vm1 = vcmask 1041408   ;;  %vm188_vm2 = vcmask 1042432   ;;  %vm190_vm3 = vcmask 1043456   ;;  %p643_p11 = scmp.ne.s32.totalorder %s636_s28, 0 }
  0x41   : > { %431 = vsyncadd (%p642_p3), [#allocation5], 4294966784  ;;  %p116_p8 = scmp.lt.s32.totalorder %s568_s18, 15  ;;  %s121_s23 = sadd.s32 1, %s568_s18  ;;  %vm192_vm4 = vcmask 1044480   ;;  %vm194_vm5 = vcmask 1045504  }
  0x42   : > { %p122_p9 = scmp.lt.s32.totalorder %s121_s23, 15  ;;  %s127_s26 = sadd.s32 2, %s568_s18  ;;  %vm196_vm6 = vcmask 1046528  }
  0x43   : > { %s117_s25 = scalar_select %p116_p8, %s568_s18, 15 }
  0x44   : > { %p128_p12 = scmp.lt.s32.totalorder %s127_s26, 15  ;;  %s650_s23 = smov (!%p122_p9, %s121_s23), 15 }
  0x45   : > { %s118_s30 = sld [smem:[#allocation3 + %s117_s25]]  ;;  %s133_s4 = sadd.s32 3, %s568_s18 }
  0x46   : > { %s652_s26 = smov (!%p128_p12, %s127_s26), 15  ;;  %s124_s3 = sld [smem:[#allocation3 + %s650_s23]] }
  0x47   : > { %s130_s5 = sld [smem:[#allocation3 + %s652_s26]]  ;;  %p134_p13 = scmp.lt.s32.totalorder %s133_s4, 15 }
  0x48   : > { %s139_s6 = sadd.s32 4, %s568_s18  ;;  %s145_s7 = sadd.s32 5, %s568_s18 }
  0x49   : > { %p140_p1 = scmp.lt.s32.totalorder %s139_s6, 15  ;;  %s654_s4 = smov (!%p134_p13, %s133_s4), 15 }
  0x4a   : > { %s136_s8 = sld [smem:[#allocation3 + %s654_s4]]  ;;  %p146_p5 = scmp.lt.s32.totalorder %s145_s7, 15 }
  0x4b   : > { %s656_s6 = smov (!%p140_p1, %s139_s6), 15  ;;  %s119_s9 = scalar_lea.vmem [#allocation4], %s118_s30 }
  0x4c   : > { %v120_v0 = vld [vmem:[%s119_s9] sm:$0x1]  ;;  %s125_s10 = scalar_lea.vmem [#allocation4], %s124_s3  ;;  %s142_s11 = sld [smem:[#allocation3 + %s656_s6]] }
  0x4d   : > { %v126_v1 = vld [vmem:[%s125_s10] sm:$0x1]  ;;  %s131_s12 = scalar_lea.vmem [#allocation4], %s130_s5  ;;  %s151_s13 = sadd.s32 6, %s568_s18 }
  0x4e   : > { %v132_v2 = vld [vmem:[%s131_s12] sm:$0x1]  ;;  %v164_v3 = vrot.slane %v126_v1, 7  ;;  %p152_p6 = scmp.lt.s32.totalorder %s151_s13, 15  ;;  %s157_s14 = sadd.s32 7, %s568_s18 }
  0x4f   : > { %v167_v4 = vrot.slane %v132_v2, 6  ;;  %s658_s7 = smov (!%p146_p5, %s145_s7), 15  ;;  %s112_s23 = sand.u32 1, %s442_s20  }
  0x50   : > { %v185_v5 = vsel %vm184_vm0, %v120_v0, %v164_v3  ;;  %s660_s13 = smov (!%p152_p6, %s151_s13), 15  ;;  %s148_s15 = sld [smem:[#allocation3 + %s658_s7]] }
  0x51   : > { %s137_s16 = scalar_lea.vmem [#allocation4], %s136_s8  ;;  %s154_s17 = sld [smem:[#allocation3 + %s660_s13]]  ;;  %v187_v7 = vsel %vm186_vm1, %v185_v5, %v167_v4 }
  0x52   : > { %v138_v6 = vld [vmem:[%s137_s16] sm:$0x1]  ;;  %s143_s25 = scalar_lea.vmem [#allocation4], %s142_s11  ;;  %p158_p7 = scmp.lt.s32.totalorder %s157_s14, 15 }
  0x53   : > { %v144_v8 = vld [vmem:[%s143_s25] sm:$0x1]  ;;  %v170_v9 = vrot.slane %v138_v6, 5  ;;  %s285_s18 = sshll.u32 %s112_s23, 3  ;;  %s288_s6 = sshll.u32 %s505_s0, 7 }
  0x54   : > { %v173_v10 = vrot.slane %v144_v8, 4  ;;  %s662_s14 = smov (!%p158_p7, %s157_s14), 15  ;;  %s114_s4 = scalar_lea.vmem [#allocation7], %s285_s18 }
  0x55   : > { %v189_v11 = vsel %vm188_vm2, %v187_v7, %v170_v9  ;;  %s160_s26 = sld [smem:[#allocation3 + %s662_s14]]  ;;  %s213_s5 = sshll.u32 %s114_s4, 4  ;;  %s583_s5 = int_to_ptr.vmem [resolvable:$true] %s213_s5 }
  0x56   : > { %s149_s30 = scalar_lea.vmem [#allocation4], %s148_s15  ;;  %v191_v13 = vsel %vm190_vm3, %v189_v11, %v173_v10  ;;  %s588_s10 = scalar_lea.hbm %s632_s2, %s288_s6 }
  0x57   : > { %v150_v12 = vld [vmem:[%s149_s30] sm:$0x1]  ;;  %s155_s3 = scalar_lea.vmem [#allocation4], %s154_s17  ;;  %s200_s11 = scalar_lea.sflag [#allocation6], %s112_s23 }
  0x58   : > { %v156_v14 = vld [vmem:[%s155_s3] sm:$0x1]  ;;  %v176_v15 = vrot.slane %v150_v12, 3  ;;  %s382_s0 = scalar_lea.vmem %s583_s5, 128  ;;  %s456_s12 = smov [#allocation7]  }
  0x59   : > { %v179_v16 = vrot.slane %v156_v14, 2  ;;  %p383_p10 = scmp.ne.s32.totalorder %s583_s5, %s382_s0  ;;  %s386_s13 = sshll.u32 %s456_s12, 4  ;;  %s387_s13 = int_to_ptr.vmem [resolvable:$false] %s386_s13 }
  0x5a   : > { %v193_v17 = vsel %vm192_vm4, %v191_v13, %v176_v15  ;;  %s388_s14 = scalar_lea.vmem %s387_s13, 256  ;;  %p389_p4 = scmp.lt.s32.totalorder %s583_s5, %s387_s13 }
  0x5b   : > { %s161_s7 = scalar_lea.vmem [#allocation4], %s160_s26  ;;  %v195_v19 = vsel %vm194_vm5, %v193_v17, %v179_v16  ;;  %p384_p0 = pnand %p383_p10, %p643_p11 }
  0x5c   : > { %v162_v18 = vld [vmem:[%s161_s7] sm:$0x1]  ;;  %p390_p3 = scmp.lt.s32.totalorder %s388_s14, %s382_s0 }
  0x5d   : > { %v182_v20 = vrot.slane %v162_v18, 1  ;;  %p385_p2 = pneg %p384_p0 }
  0x5e   : > { %p391_p8 = por %p390_p3, %p389_p4 }
  0x5f   : > { %v197_v21 = vsel %vm196_vm6, %v195_v19, %v182_v20 }
  0x60   : > { %198 = vst [vmem:[%s114_s4] sm:$0xff] %v197_v21  ;;  %p392_p9 = pnand %p391_p8, %p385_p2 }
  0x62   : > { %395 = shalt.err (!%p392_p9)
}
  0x63   : > { %s396_s15 = scalar_lea.hbm %s588_s10, 128  ;;  %s400_s23 = scalar_lea.hbm %s632_s2, 256 }
  0x64   : > { %p397_p12 = scmp.ne.s32.totalorder %s588_s10, %s396_s15  ;;  %p401_p5 = scmp.lt.u32.totalorder %s588_s10, %s632_s2 }
  0x65   : > { %p402_p6 = scmp.lt.u32.totalorder %s400_s23, %s396_s15  ;;  %p404_p10 = scmp.lt.u32.totalorder %s396_s15, %s588_s10 }
  0x66   : > { %p398_p13 = pnand %p397_p12, %p643_p11 }
  0x67   : > { %p403_p7 = por %p402_p6, %p401_p5 }
  0x68   : > { %p399_p1 = pneg %p398_p13 }
  0x69   : > { %p405_p0 = por %p404_p10, %p403_p7 }
  0x6b   : > { %p406_p2 = pnand %p405_p0, %p399_p1 }
  0x6d   : > { %409 = shalt.err (!%p406_p2)
}
  0x6e   : > { %295 = dma.vmem_to_hbm [thread:$0]  (%p643_p11), %s583_s5, 128, %s588_s10, %s200_s11  }
  0x6f PF: > { %p307_p4 = scmp.ge.s32.totalorder %s450_s22, 2  ;;  %s225_s26 = sand.u32 1, %s438_s19  }
  0x70   : > { %p644_p3 = scmp.ne.s32.totalorder %s637_s29, 0  ;;  %s226_s30 = scalar_lea.sflag [#allocation6], %s225_s26 }
  0x72   : > { %p302_p8 = pnand %p307_p4, %p644_p3 }
  0x74   : > { %433 = dma.done.wait (!%p302_p8), %s226_s30, 128  }
  0x75   : > { %435 = vsyncadd (!%p302_p8), %s226_s30, 4294967168  ;;  %p17_p9 = scmp.ge.s32.totalorder %s509_s24, 4   ;;  %s645_s19 = smov %s442_s20 }
  0x76   : > { %s646_s20 = smov %s446_s21  ;;  %s647_s21 = smov %s520_s27 }
  0x77   : > { %s648_s22 = smov %s509_s24  ;;  %19 = sbr.rel (!%p17_p9) target bundleno = 16 (0x10), region = 69 }
  0x7e   :  { %231 = vsyncpa [#allocation5], 1 }
  0x7f   :  { %233 = vsyncpa [#allocation5 + $0x1], 1 }
  0x80   :  { %234 = vsyncpa [#allocation6], 1 }
  0x81   :  { %236 = vsyncpa [#allocation6 + $0x1], 1 }

</bundles_post_ra>
